<compile_context>
chip_gen: v5e
topology: v5e:2x2
jax: 0.10.0
libtpu: 0.0.40
codegen_flags: <defaults>
</compile_context>

<pallas_src>
import jax
import jax.numpy as jnp
import numpy as np
from jax.experimental import pallas as pl
from jax.experimental.pallas import tpu as pltpu


# ----------------------------------------------------------------------------
# Kernel 1: global average pool (tiled reduction) + linear/ReLU + linear/sigmoid
# ----------------------------------------------------------------------------
def ca_feats_kernel(x_ref, w1_ref, b1_ref, w2_ref, b2_ref, feats_ref, acc_ref,
                    *, inv_hw):
    k = pl.program_id(0)

    @pl.when(k == 0)
    def _init():
        acc_ref[...] = jnp.zeros_like(acc_ref)

    # x_ref block: (N, C, tile_hw) — lane-dense reduce over the spatial axis.
    x = x_ref[...].astype(jnp.float32)
    acc_ref[...] += jnp.sum(x, axis=-1)              # (N, C) partial sums

    @pl.when(k == pl.num_programs(0) - 1)
    def _finalize():
        pooled = acc_ref[...] * inv_hw               # (N, C) mean over H*W
        # linear_1 + ReLU  (w1_ref already transposed to (C, C//4))
        h1 = jnp.dot(pooled, w1_ref[...],
                     preferred_element_type=jnp.float32) + b1_ref[...]
        h1 = jnp.maximum(h1, 0.0)
        # linear_2 + sigmoid (w2_ref already transposed to (C//4, C))
        h2 = jnp.dot(h1, w2_ref[...],
                     preferred_element_type=jnp.float32) + b2_ref[...]
        feats_ref[...] = jax.nn.sigmoid(h2).astype(feats_ref.dtype)


# ----------------------------------------------------------------------------
# Kernel 2: broadcast per-(n,c) attention value across the spatial dims.
# Operates on the flattened (N*C, H*W) view so stores are lane-dense.
# ----------------------------------------------------------------------------
def expand_kernel(feats_ref, out_ref):
    # feats_ref: (rows_tile, 1) VMEM column; out_ref: (rows_tile, hw_tile).
    out_ref[...] = jnp.broadcast_to(feats_ref[...], out_ref.shape).astype(
        out_ref.dtype)


def _pick_tile(total, align, max_elems):
    """Largest multiple of `align` that divides `total` and is <= max_elems.

    Falls back to `total` (full extent) if no such divisor exists or the whole
    axis already fits.
    """
    if total <= max_elems:
        return total
    t = (max_elems // align) * align
    while t >= align:
        if total % t == 0:
            return t
        t -= align
    return total


def channelwise_attention(x, w1, b1, w2, b2):
    """x: (N, C, H, W).  w1: (C//4, C), b1: (C//4,), w2: (C, C//4), b2: (C,)
    (PyTorch nn.Linear convention: weight is (out_features, in_features))."""
    n, c, h, w = x.shape
    c4 = w1.shape[0]
    hw = h * w
    nc = n * c

    # Free (contiguous) views / tiny transposes done once in the wrapper.
    x_flat = x.reshape(n, c, hw)
    w1_t = jnp.transpose(w1)            # (C, C//4)
    w2_t = jnp.transpose(w2)            # (C//4, C)
    b1_2d = b1.reshape(1, c4)
    b2_2d = b2.reshape(1, c)

    # ---- Kernel 1: pooled -> feats (N, C) -----------------------------------
    # Spatial tile: keep each (N, C, tile_hw) input block around <= 2 MiB so
    # double-buffering fits comfortably in scoped VMEM on v5e/v6e/v7x.
    max_hw_elems = max(128, (2 << 20) // (4 * n * c))
    tile_hw = _pick_tile(hw, 128, max_hw_elems)
    num_hw_tiles = hw // tile_hw

    feats = pl.pallas_call(
        lambda *refs: ca_feats_kernel(*refs, inv_hw=1.0 / float(hw)),
        out_shape=jax.ShapeDtypeStruct((n, c), jnp.float32),
        grid=(num_hw_tiles,),
        in_specs=[
            pl.BlockSpec((n, c, tile_hw), lambda k: (0, 0, k)),
            pl.BlockSpec((c, c4), lambda k: (0, 0)),
            pl.BlockSpec((1, c4), lambda k: (0, 0)),
            pl.BlockSpec((c4, c), lambda k: (0, 0)),
            pl.BlockSpec((1, c), lambda k: (0, 0)),
        ],
        out_specs=pl.BlockSpec((n, c), lambda k: (0, 0)),
        scratch_shapes=[pltpu.VMEM((n, c), jnp.float32)],
        compiler_params=pltpu.CompilerParams(
            dimension_semantics=("arbitrary",)),
    )(x_flat, w1_t, b1_2d, w2_t, b2_2d)

    # ca_act_reg = mean(feats): tiny, let XLA handle it in the wrapper.
    ca_act_reg = jnp.mean(feats)

    # ---- Kernel 2: expand feats to (N, C, H, W) via lane-dense (N*C, H*W) ---
    feats_col = feats.reshape(nc, 1)

    hw_tile = _pick_tile(hw, 128, 16384)                       # <= 64 KiB rows
    max_row_elems = max(8, (2 << 20) // (4 * hw_tile))         # ~2 MiB blocks
    rows_tile = _pick_tile(nc, 8, max_row_elems)

    out_flat = pl.pallas_call(
        expand_kernel,
        out_shape=jax.ShapeDtypeStruct((nc, hw), x.dtype),
        grid=(nc // rows_tile, hw // hw_tile),
        in_specs=[pl.BlockSpec((rows_tile, 1), lambda i, j: (i, 0))],
        out_specs=pl.BlockSpec((rows_tile, hw_tile), lambda i, j: (i, j)),
        compiler_params=pltpu.CompilerParams(
            dimension_semantics=("parallel", "parallel")),
    )(feats_col)

    return out_flat.reshape(n, c, h, w), ca_act_reg


# ----------------------------------------------------------------------------
# Pure-JAX reference (mirrors the PyTorch module).
# ----------------------------------------------------------------------------
def reference(x, w1, b1, w2, b2):
    n, c, h, w = x.shape
    pooled = jnp.mean(x, axis=(2, 3))                     # (N, C)
    h1 = jax.nn.relu(pooled @ w1.T + b1)
    feats = jax.nn.sigmoid(h1 @ w2.T + b2)
    reg = jnp.mean(feats)
    return jnp.broadcast_to(feats[:, :, None, None], (n, c, h, w)), reg


if __name__ == "__main__":
    N, C, H, W = 2, 16, 16, 16
    C4 = C // 4

    key = jax.random.PRNGKey(0)
    kx, kw1, kb1, kw2, kb2 = jax.random.split(key, 5)

    x = jax.random.normal(kx, (N, C, H, W), dtype=jnp.float32)

    # deterministic nn.Linear-style init: U(-1/sqrt(fan_in), 1/sqrt(fan_in))
    bound1 = 1.0 / np.sqrt(C)
    w1 = jax.random.uniform(kw1, (C4, C), jnp.float32, -bound1, bound1)
    b1 = jax.random.uniform(kb1, (C4,), jnp.float32, -bound1, bound1)
    bound2 = 1.0 / np.sqrt(C4)
    w2 = jax.random.uniform(kw2, (C, C4), jnp.float32, -bound2, bound2)
    b2 = jax.random.uniform(kb2, (C,), jnp.float32, -bound2, bound2)

    feats_out, ca_act_reg = channelwise_attention(x, w1, b1, w2, b2)
    feats_out = jax.block_until_ready(feats_out)
    ca_act_reg = jax.block_until_ready(ca_act_reg)

    feats_ref, reg_ref = reference(x, w1, b1, w2, b2)
    np.testing.assert_allclose(np.asarray(feats_out), np.asarray(feats_ref),
                               rtol=1e-5, atol=1e-5)
    np.testing.assert_allclose(float(ca_act_reg), float(reg_ref),
                               rtol=1e-5, atol=1e-5)

    print("KERNEL_OK")
</pallas_src>

<mosaic_0001>
module attributes {stable_mosaic.version = 11 : i64} {
  func.func @_lambda_(%arg0: i32, %arg1: memref<2x16x256xf32, #tpu.memory_space<vmem>>, %arg2: memref<16x4xf32, #tpu.memory_space<vmem>>, %arg3: memref<1x4xf32, #tpu.memory_space<vmem>>, %arg4: memref<4x16xf32, #tpu.memory_space<vmem>>, %arg5: memref<1x16xf32, #tpu.memory_space<vmem>>, %arg6: memref<2x16xf32, #tpu.memory_space<vmem>>, %arg7: memref<2x16xf32, #tpu.memory_space<vmem>>) attributes {dimension_semantics = [#tpu.dimension_semantics<arbitrary>], iteration_bounds = array<i64: 1>, scalar_prefetch = 0 : i64, scratch_operands = 1 : i64, tpu.core_type = #tpu.core_type<tc>, window_params = [{transform_indices = @transform_0, window_bounds = array<i64: 2, 16, 256>}, {pipeline_mode = #tpu.pipeline_mode<synchronous>, transform_indices = @transform_1, window_bounds = array<i64: 16, 4>}, {pipeline_mode = #tpu.pipeline_mode<synchronous>, transform_indices = @transform_2, window_bounds = array<i64: 1, 4>}, {pipeline_mode = #tpu.pipeline_mode<synchronous>, transform_indices = @transform_3, window_bounds = array<i64: 4, 16>}, {pipeline_mode = #tpu.pipeline_mode<synchronous>, transform_indices = @transform_4, window_bounds = array<i64: 1, 16>}, {pipeline_mode = #tpu.pipeline_mode<synchronous>, transform_indices = @transform_5, window_bounds = array<i64: 2, 16>}]} {
    %c0_i32 = arith.constant 0 : i32
    %0 = arith.cmpi eq, %arg0, %c0_i32 : i32
    %1 = arith.extui %0 : i1 to i32
    %c0_i32_0 = arith.constant 0 : i32
    %2 = arith.cmpi ne, %1, %c0_i32_0 : i32
    scf.if %2 {
      %cst_9 = arith.constant 0.000000e+00 : f32
      %11 = vector.broadcast %cst_9 : f32 to vector<2x16xf32>
      %c0_10 = arith.constant 0 : index
      %c0_11 = arith.constant 0 : index
      %12 = vector.load %arg7[%c0_10, %c0_11] : memref<2x16xf32, #tpu.memory_space<vmem>>, vector<2x16xf32>
      tpu.vector_store %arg7[%c0_10, %c0_11], %11 {strides = array<i32>} : memref<2x16xf32, #tpu.memory_space<vmem>>, vector<2x16xf32>,
    } else {
    }
    %c0 = arith.constant 0 : index
    %c0_1 = arith.constant 0 : index
    %c0_2 = arith.constant 0 : index
    %3 = vector.load %arg1[%c0, %c0_1, %c0_2] : memref<2x16x256xf32, #tpu.memory_space<vmem>>, vector<2x16x256xf32>
    %c0_3 = arith.constant 0 : index
    %c0_4 = arith.constant 0 : index
    %4 = vector.load %arg7[%c0_3, %c0_4] : memref<2x16xf32, #tpu.memory_space<vmem>>, vector<2x16xf32>
    %cst = arith.constant dense<0.000000e+00> : vector<2x16xf32>
    %5 = vector.multi_reduction <add>, %3, %cst [2] : vector<2x16x256xf32> to vector<2x16xf32>
    %6 = arith.addf %4, %5 : vector<2x16xf32>
    %c0_5 = arith.constant 0 : index
    %c0_6 = arith.constant 0 : index
    %7 = vector.load %arg7[%c0_5, %c0_6] : memref<2x16xf32, #tpu.memory_space<vmem>>, vector<2x16xf32>
    tpu.vector_store %arg7[%c0_5, %c0_6], %6 {strides = array<i32>} : memref<2x16xf32, #tpu.memory_space<vmem>>, vector<2x16xf32>,
    %c0_i32_7 = arith.constant 0 : i32
    %8 = arith.cmpi eq, %arg0, %c0_i32_7 : i32
    %9 = arith.extui %8 : i1 to i32
    %c0_i32_8 = arith.constant 0 : i32
    %10 = arith.cmpi ne, %9, %c0_i32_8 : i32
    scf.if %10 {
      %c0_9 = arith.constant 0 : index
      %c0_10 = arith.constant 0 : index
      %11 = vector.load %arg7[%c0_9, %c0_10] : memref<2x16xf32, #tpu.memory_space<vmem>>, vector<2x16xf32>
      %cst_11 = arith.constant 3.906250e-03 : f32
      %12 = vector.broadcast %cst_11 : f32 to vector<2x16xf32>
      %13 = arith.mulf %11, %12 : vector<2x16xf32>
      %c0_12 = arith.constant 0 : index
      %c0_13 = arith.constant 0 : index
      %14 = vector.load %arg2[%c0_12, %c0_13] : memref<16x4xf32, #tpu.memory_space<vmem>>, vector<16x4xf32>
      %cst_14 = arith.constant dense<0.000000e+00> : vector<2x4xf32>
      %15 = tpu.matmul %13, %14, %cst_14 {dimension_numbers = #tpu.dot_dimension_numbers<[1], [0], [0], [1], [0, 0, 1, 1], [], []>} : vector<2x16xf32>, vector<16x4xf32>, vector<2x4xf32> -> vector<2x4xf32>
      %c0_15 = arith.constant 0 : index
      %c0_16 = arith.constant 0 : index
      %16 = vector.load %arg3[%c0_15, %c0_16] : memref<1x4xf32, #tpu.memory_space<vmem>>, vector<1x4xf32>
      %17 = vector.broadcast %16 : vector<1x4xf32> to vector<2x4xf32>
      %18 = arith.addf %15, %17 : vector<2x4xf32>
      %cst_17 = arith.constant 0.000000e+00 : f32
      %19 = vector.broadcast %cst_17 : f32 to vector<2x4xf32>
      %20 = arith.maximumf %18, %19 : vector<2x4xf32>
      %c0_18 = arith.constant 0 : index
      %c0_19 = arith.constant 0 : index
      %21 = vector.load %arg4[%c0_18, %c0_19] : memref<4x16xf32, #tpu.memory_space<vmem>>, vector<4x16xf32>
      %cst_20 = arith.constant dense<0.000000e+00> : vector<2x16xf32>
      %22 = tpu.matmul %20, %21, %cst_20 {dimension_numbers = #tpu.dot_dimension_numbers<[1], [0], [0], [1], [0, 0, 1, 1], [], []>} : vector<2x4xf32>, vector<4x16xf32>, vector<2x16xf32> -> vector<2x16xf32>
      %c0_21 = arith.constant 0 : index
      %c0_22 = arith.constant 0 : index
      %23 = vector.load %arg5[%c0_21, %c0_22] : memref<1x16xf32, #tpu.memory_space<vmem>>, vector<1x16xf32>
      %24 = vector.broadcast %23 : vector<1x16xf32> to vector<2x16xf32>
      %25 = arith.addf %22, %24 : vector<2x16xf32>
      %26 = arith.negf %25 : vector<2x16xf32>
      %27 = math.exp %26 : vector<2x16xf32>
      %cst_23 = arith.constant 1.000000e+00 : f32
      %28 = vector.broadcast %cst_23 : f32 to vector<2x16xf32>
      %29 = arith.addf %28, %27 : vector<2x16xf32>
      %30 = arith.divf %28, %29 : vector<2x16xf32>
      %c0_24 = arith.constant 0 : index
      %c0_25 = arith.constant 0 : index
      %31 = vector.load %arg6[%c0_24, %c0_25] : memref<2x16xf32, #tpu.memory_space<vmem>>, vector<2x16xf32>
      tpu.vector_store %arg6[%c0_24, %c0_25], %30 {strides = array<i32>} : memref<2x16xf32, #tpu.memory_space<vmem>>, vector<2x16xf32>,
    } else {
    }
    return
  }
  func.func @transform_0(%arg0: i32) -> (i32, i32, i32) {
    %c0_i32 = arith.constant 0 : i32
    %c0_i32_0 = arith.constant 0 : i32
    %c0_i32_1 = arith.constant 0 : i32
    return %c0_i32, %c0_i32_0, %arg0 : i32, i32, i32
  }
  func.func @transform_1(%arg0: i32) -> (i32, i32) {
    %c0_i32 = arith.constant 0 : i32
    %c0_i32_0 = arith.constant 0 : i32
    %c0_i32_1 = arith.constant 0 : i32
    return %c0_i32, %c0_i32_0 : i32, i32
  }
  func.func @transform_2(%arg0: i32) -> (i32, i32) {
    %c0_i32 = arith.constant 0 : i32
    %c0_i32_0 = arith.constant 0 : i32
    %c0_i32_1 = arith.constant 0 : i32
    return %c0_i32, %c0_i32_0 : i32, i32
  }
  func.func @transform_3(%arg0: i32) -> (i32, i32) {
    %c0_i32 = arith.constant 0 : i32
    %c0_i32_0 = arith.constant 0 : i32
    %c0_i32_1 = arith.constant 0 : i32
    return %c0_i32, %c0_i32_0 : i32, i32
  }
  func.func @transform_4(%arg0: i32) -> (i32, i32) {
    %c0_i32 = arith.constant 0 : i32
    %c0_i32_0 = arith.constant 0 : i32
    %c0_i32_1 = arith.constant 0 : i32
    return %c0_i32, %c0_i32_0 : i32, i32
  }
  func.func @transform_5(%arg0: i32) -> (i32, i32) {
    %c0_i32 = arith.constant 0 : i32
    %c0_i32_0 = arith.constant 0 : i32
    %c0_i32_1 = arith.constant 0 : i32
    return %c0_i32, %c0_i32_0 : i32, i32
  }
}

</mosaic_0001>

<bundles_post_ra>
// kernel: tpu_custom_call.1
= control target key start
LH: loop header
LB: loop body
LE: loop exit
PB: predicated region body
PF: predicated region fallthrough
CT: control target
= control target key end

     0   :  { %10 = vsyncpa [#allocation4], 0  ;;  %s316_s0 = inlined_call_operand.hbm [shape: f32[2,16,256], index: 0, kind: input, shape index: {}]   ;;  %s317_s1 = inlined_call_operand.vmem [shape: f32[16,4], index: 1, kind: input, shape index: {}]   ;;  %s318_s2 = inlined_call_operand.vmem [shape: f32[1,4], index: 2, kind: input, shape index: {}]   ;;  %s319_s3 = inlined_call_operand.vmem [shape: f32[4,16], index: 3, kind: input, shape index: {}]   ;;  %s320_s4 = inlined_call_operand.vmem [shape: f32[1,16], index: 4, kind: input, shape index: {}]   ;;  %s321_s5 = inlined_call_operand.hbm [shape: f32[2,16], index: 5, kind: output, shape index: {}]  }
   0x1   :  { %11 = vsyncpa [#allocation5], 0  ;;  %s16_s20 = sshll.u32 %s316_s0, 4  ;;  %s257_s21 = smov [#allocation3]   ;;  %s17_s20 = int_to_ptr.hbm [resolvable:$true] %s16_s20 }
   0x2   :  { %s18_s22 = sshll.u32 %s257_s21, 4  ;;  %s258_s23 = smov 256   ;;  %s19_s22 = int_to_ptr.vmem [resolvable:$true] %s18_s22 }
   0x3   :  { %s259_s24 = smov 16  }
   0x4   :  { %24 = dma.hbm_to_vmem [thread:$0]  %s17_s20, 1024, %s19_s22, [#allocation4], %s258_s23, %s258_s23, %s259_s24  }
   0x5   :  { %253 = dma.done.wait [#allocation4], 1024  }
   0x6   :  { %254 = vsyncadd [#allocation4], 4294966272  ;;  %v47_v0 = vld [vmem:[#allocation3 + $0x20] sm:$0xff]  ;;  %v48_v1 = vld [vmem:[#allocation3 + $0x28] sm:$0xff]  ;;  %vm41_vm0 = vcmask 123904   ;;  %v260_v12 = vmov 0.0   ;;  %v68_v15 = vlaneseq }
   0x7   :  { %v43_v2 = vld [vmem:[#allocation3] sm:$0xff]  ;;  %v58_v3 = vadd.f32 %v48_v1, %v47_v0  ;;  %v44_v4 = vld [vmem:[#allocation3 + $0x8] sm:$0xff]  ;;  %v49_v6 = vld [vmem:[#allocation3 + $0x30] sm:$0xff]  ;;  %42 = vst.msk [vmem:[#allocation2] sm:$0x3] %vm41_vm0, %v260_v12  ;;  %vm73_vm1 = vcmask 130112  }
   0x8   :  { %v52_v5 = vadd.f32 %v44_v4, %v43_v2  ;;  %v50_v7 = vld [vmem:[#allocation3 + $0x38] sm:$0xff]  ;;  %v45_v8 = vld [vmem:[#allocation3 + $0x10] sm:$0xff]  ;;  %v90_v13 = vld [vmem:[%s317_s1 + $0x8] sm:$0xff]  ;;  %v69_v18 = vand.u32 127, %v68_v15  ;;  %vm78_vm2 = vcmask 1041409   ;;  %vm95_vm3 = vcmask 130048  }
   0x9   :  { %59 = vadd.xlane.f32.xlu1 %v58_v3  ;;  %v46_v9 = vld [vmem:[#allocation3 + $0x18] sm:$0xff]  ;;  %v61_v10 = vadd.f32 %v50_v7, %v49_v6  ;;  %113 = vmatpush.msra.mxu0 %v90_v13  ;;  %vm129_vm4 = vcmask 1043456   ;;  %vm125_vm5 = vcmask 31744  }
   0xa   :  { %53 = vadd.xlane.f32.xlu0 %v52_v5  ;;  %v55_v11 = vadd.f32 %v46_v9, %v45_v8  ;;  %v89_v14 = vld [vmem:[%s317_s1] sm:$0xff]  ;;  %v71_v19 = vadd.s32 4294967288, %v69_v18 }
   0xb   :  { %114 = vmatpush.msra.mxu0 %v89_v14  ;;  %v120_v33 = vld [vmem:[%s319_s3] sm:$0xf] }
   0xc   :  { %191 = vmatpush.msk.msra.mxu1 %vm129_vm4, %v120_v33  ;;  %v199_v34 = vld [vmem:[%s318_s2] ss:$0 sm:$0xff]  ;;  %s261_s2 = smov [#allocation6]  }
   0xd   :  { %v200_v38 = vld [vmem:[%s320_s4] ss:$0 sm:$0xff]  ;;  %s178_s3 = sshll.u32 %s261_s2, 4  ;;  %s180_s4 = sshll.u32 %s321_s5, 4  ;;  %s179_s3 = int_to_ptr.vmem [resolvable:$true] %s178_s3  ;;  %s181_s4 = int_to_ptr.hbm [resolvable:$true] %s180_s4 }
   0xe   :  { %v51_v27 = vld [vmem:[#allocation2] sm:$0x3] }
  0x11   :  { %62 = vadd.xlane.f32.xlu1 %v61_v10 }
  0x12   :  { %56 = vadd.xlane.f32.xlu0 %v55_v11 }
  0x7c   :  { %v60_v16 = vpop.xlane.xlu1 %59 }
  0x7d   :  { %v54_v17 = vpop.xlane.xlu0 %53  ;;  %v75_v21 = vperm.slane %v60_v16, %v69_v18 }
  0x7e   :  { %v70_v24 = vperm.slane %v54_v17, %v69_v18 }
  0x84   :  { %v63_v20 = vpop.xlane.xlu1 %62 }
  0x85   :  { %v76_v22 = vperm.slane %v63_v20, %v71_v19  ;;  %v57_v23 = vpop.xlane.xlu0 %56 }
  0x86   :  { %v72_v25 = vperm.slane %v57_v23, %v71_v19 }
  0x87   :  { %v77_v26 = vsel %vm73_vm1, %v76_v22, %v75_v21 }
  0x88   :  { %v74_v28 = vsel %vm73_vm1, %v72_v25, %v70_v24 }
  0x89   :  { %v79_v29 = vsel %vm78_vm2, %v77_v26, %v74_v28 }
  0x8a   :  { %v81_v30 = vadd.f32 %v79_v29, %v51_v27 }
  0x8c   :  { %83 = vst.msk [vmem:[#allocation2] sm:$0x3] %vm41_vm0, %v81_v30 }
  0x93   :  { %v87_v31 = vld [vmem:[#allocation2] sm:$0x3] }
  0x94   :  { %v88_v32 = vmul.f32 0.00390625, %v87_v31 }
  0x96   :  { %190 = vmatmul.msk.f32.vlgmr.msra.gmra.mxu0 %vm95_vm3, %v88_v32 }
 0x113   :  { %v116_v35 = vpop.f32.mrf.mxu0 }
 0x114   :  { %v117_v36 = vadd.f32 %v199_v34, %v116_v35 }
 0x116   :  { %v119_v37 = vmax.f32 %v117_v36, 0.0 }
 0x118   :  { %192 = vmatmul.msk.f32.vlgmr.msra.gmra.mxu1 %vm125_vm5, %v119_v37 }
 0x195   :  { %v150_v39 = vpop.f32.mrf.mxu1 }
 0x196   :  { %v151_v40 = vadd.f32 %v200_v38, %v150_v39 }
 0x198   :  { %v193_v41 = vmul.f32 -1.442695, %v151_v40 }
 0x19a   :  { %201 = vpow2.f32 %v193_v41 }
 0x1a0   :  { %v202_v42 = vpop.eup %201 }
 0x1a1   :  { %v156_v43 = vadd.f32 1.0, %v202_v42 }
 0x1a3   :  { %203 = vrcp.f32 %v156_v43  ;;  %v168_v47 = vand.u32 2147483648, %v156_v43  ;;  %v166_v49 = vand.u32 2147483647, %v156_v43  ;;  %vm162_vm7 = vweird.f32 %v156_v43 }
 0x1a5   :  { %v169_v51 = vor.u32 1.1754944e-38, %v168_v47  ;;  %vm167_vm9 = vcmp.eq.f32.partialorder %v166_v49, 8.507059e+37 }
 0x1a9   :  { %v204_v44 = vpop.eup %203 }
 0x1aa   :  { %v158_v45 = vmul.f32 %v204_v44, %v156_v43  ;;  %vm163_vm6 = vweird.f32 %v204_v44 }
 0x1ab   :  { %vm164_vm8 = vmor %vm162_vm7, %vm163_vm6 }
 0x1ac   :  { %v159_v46 = vsub.f32 1.0, %v158_v45 }
 0x1ae   :  { %v160_v48 = vmul.f32 %v204_v44, %v159_v46 }
 0x1b0   :  { %v161_v50 = vadd.f32 %v204_v44, %v160_v48 }
 0x1b2   :  { %v165_v52 = vsel %vm164_vm8, %v204_v44, %v161_v50 }
 0x1b3   :  { %v170_v53 = vsel %vm167_vm9, %v169_v51, %v165_v52 }
 0x1b4   :  { %172 = vst.msk [vmem:[#allocation6] sm:$0x3] %vm41_vm0, %v170_v53 }
 0x1b5   :  { %183 = dma.vmem_to_hbm [thread:$0]  %s179_s3, 32, %s181_s4, [#allocation5]  }
 0x1b6   :  { %255 = dma.done.wait [#allocation5], 32  }
 0x1b7   :  { %256 = vsyncadd [#allocation5], 4294967264 }
 0x1b8   :  { %188 = vsyncpa [#allocation4], 1 }
 0x1b9   :  { %189 = vsyncpa [#allocation5], 1 }

</bundles_post_ra>
